<compile_context>
chip_gen: v5e
topology: v5e:2x2
jax: 0.10.0
libtpu: 0.0.40
codegen_flags: <defaults>
</compile_context>

<pallas_src>
import numpy as np
import jax
import jax.numpy as jnp
from jax.experimental import pallas as pl
from jax.experimental.pallas import tpu as pltpu


def _freq_mask_kernel(bounds_ref, x_ref, o_ref):
    # bounds_ref: SMEM int32[4] = [lo, hi, first_block, last_block] (flattened lanes).
    # x_ref / o_ref: VMEM (block_rows, block_lanes) slab of the visited lane block.
    lo = bounds_ref[0]
    hi = bounds_ref[1]
    first = bounds_ref[2]
    last = bounds_ref[3]
    blk = jnp.minimum(first + pl.program_id(1), last)       # actual lane-block index
    base = blk * x_ref.shape[-1]
    # Small (1, block_lanes) absolute-lane iota; the select broadcasts over rows.
    lane = base + jax.lax.broadcasted_iota(jnp.int32, (1, x_ref.shape[-1]), 1)
    keep = jnp.logical_or(lane < lo, lane >= hi)             # masked band is contiguous
    o_ref[...] = jnp.where(keep, x_ref[...], jnp.zeros((), x_ref.dtype))


def _vmem_capacity_bytes():
    try:
        return int(getattr(pltpu.get_tpu_info(), "vmem_capacity_bytes", 64 << 20))
    except Exception:
        return 64 << 20                                      # conservative fallback


def _choose_blocks(rows, lanes, itemsize, target_bytes):
    """(block_rows, block_lanes) obeying the (sublane, 128) tiling rule."""
    sublane = {4: 8, 2: 16, 1: 32}.get(itemsize, 8)

    # Row axis: keep >=2 row blocks when possible so the "parallel" axis gives both
    # v7x TensorCores work; full extent is always legal for small row counts.
    if rows < 2 * sublane:
        block_rows = rows
    else:
        block_rows = max(sublane, min((rows // 2) // sublane * sublane, 256))

    # Lane axis: multiple of 128 (ragged tail handled by Pallas), sized from the VMEM
    # budget but capped so large planes split into >=~8 blocks, keeping the sparse
    # masked-band visit fine-grained.
    if lanes < 128:
        block_lanes = lanes                                   # full extent: always legal
    else:
        by_budget = max(128, target_bytes // (block_rows * itemsize) // 128 * 128)
        by_granularity = max(128, (lanes // 8) // 128 * 128)
        block_lanes = min(by_budget, by_granularity, 512 * 1024)
    return block_rows, block_lanes


def frequency_masking(specgram, key, n_mels, min_mask_fraction, max_mask_fraction,
                      *, vmem_target_bytes=None):
    """Apply random frequency masking to specgram of shape (B, C, F, T)."""
    B, C, F, T = specgram.shape
    assert F == n_mels, "frequency axis must equal n_mels"

    min_mask = n_mels * min_mask_fraction
    max_mask = n_mels * max_mask_fraction

    # --- random mask parameters (plain JAX scalar glue, matches the module) ---
    k1, k2, k3 = jax.random.split(key, 3)
    freq_mask_param = jax.random.uniform(k1, (), minval=min_mask, maxval=max_mask,
                                         dtype=jnp.float32)
    value = jax.random.uniform(k2, (), dtype=jnp.float32) * freq_mask_param
    min_value = jax.random.uniform(k3, (), dtype=jnp.float32) * (F - value)
    mask_start = jnp.floor(min_value).astype(jnp.int32)
    mask_end = jnp.floor(min_value + value).astype(jnp.int32)

    # --- lane-dense 2-D view and generation-aware block sizing ---
    rows, lanes = B * C, F * T
    itemsize = jnp.dtype(specgram.dtype).itemsize
    vmem_cap = _vmem_capacity_bytes()
    target_bytes = (vmem_target_bytes if vmem_target_bytes is not None
                    else min(vmem_cap // 8, 16 << 20))   # ~16 MiB v5e/v6e, ~8 MiB v7x
    block_rows, block_lanes = _choose_blocks(rows, lanes, itemsize, target_bytes)
    num_row_blocks = int(pl.cdiv(rows, block_rows))
    num_lane_blocks = int(pl.cdiv(lanes, block_lanes))

    # Flattened lane-range of the masked band and the first/last overlapping blocks.
    lo = jnp.clip(mask_start * T, 0, lanes).astype(jnp.int32)
    hi = jnp.clip(mask_end * T, 0, lanes).astype(jnp.int32)
    first_block = lo // block_lanes
    last_block = jnp.maximum(first_block, (hi - 1) // block_lanes)
    bounds = jnp.stack([lo, hi, first_block, last_block]).astype(jnp.int32)

    # Static upper bound on how many lane blocks the band can overlap.
    max_masked_rows = min(F, int(np.floor(max_mask)) + 1)
    num_visit = max(1, int(min(num_lane_blocks,
                               pl.cdiv(max_masked_rows * T, block_lanes) + 1)))

    # Explicit VMEM limit: in+out double-buffered blocks + headroom, but never more
    # than 75% of physical VMEM (v7x has only 64 MiB total).
    block_bytes = block_rows * block_lanes * itemsize
    vmem_limit = int(min(max(4 * block_bytes + (2 << 20), 16 << 20),
                         (vmem_cap * 3) // 4))

    def lane_map(i, j, b_ref):
        # Visit blocks first..last of the masked band; clamp => cheap resident revisits.
        return (i, jnp.minimum(b_ref[2] + j, b_ref[3]))

    def build(n_visit, aliases):
        return pl.pallas_call(
            _freq_mask_kernel,
            out_shape=jax.ShapeDtypeStruct((rows, lanes), specgram.dtype),
            grid_spec=pltpu.PrefetchScalarGridSpec(
                num_scalar_prefetch=1,
                grid=(num_row_blocks, n_visit),
                in_specs=[pl.BlockSpec((block_rows, block_lanes), lane_map)],
                out_specs=pl.BlockSpec((block_rows, block_lanes), lane_map),
            ),
            input_output_aliases=aliases,
            compiler_params=pltpu.CompilerParams(
                dimension_semantics=("parallel", "arbitrary"),
                vmem_limit_bytes=vmem_limit,
            ),
        )

    x2d = specgram.reshape(rows, lanes)
    try:
        # Sparse visit: only masked-band lane blocks are touched; untouched blocks keep
        # the input through the alias.  Alias index 1 = x2d among (bounds, x2d).
        out2d = build(num_visit, {1: 0})(bounds, x2d)
    except Exception:
        # TODO(synk): fallback for JAX versions with a different alias-index convention:
        # dense visit of every lane block, no aliasing needed (correct, just slower).
        dense_bounds = jnp.stack(
            [lo, hi, jnp.int32(0), jnp.int32(num_lane_blocks - 1)]).astype(jnp.int32)
        out2d = build(num_lane_blocks, {})(dense_bounds, x2d)

    return out2d.reshape(B, C, F, T)


if __name__ == "__main__":
    # Small deterministic example consistent with the module's forward:
    # specgram (B, C, n_mels, time)
    B, C, N_MELS, T = 2, 4, 16, 16
    MIN_FRAC, MAX_FRAC = 0.1, 0.5

    key = jax.random.PRNGKey(0)
    k_data, k_mask = jax.random.split(key)
    specgram = jax.random.normal(k_data, (B, C, N_MELS, T), dtype=jnp.float32)
    spec_host = np.asarray(specgram)        # host snapshot (input may be aliased)

    out = frequency_masking(specgram, k_mask, N_MELS, MIN_FRAC, MAX_FRAC)
    out = jax.block_until_ready(out)
    out_host = np.asarray(out)

    # Sanity: shape/dtype preserved; every frequency bin is either zeroed or untouched,
    # identically across batch/channel (iid_masks=False), and the masked band is
    # a single contiguous range of bins.
    assert out_host.shape == spec_host.shape and out.dtype == specgram.dtype
    bin_zero = np.all(out_host == 0.0, axis=(0, 1, 3))
    bin_same = np.all(out_host == spec_host, axis=(0, 1, 3))
    assert bool(np.all(bin_zero | bin_same))
    masked = np.where(bin_zero & ~bin_same)[0]
    if masked.size:
        assert masked.max() - masked.min() + 1 == masked.size

    print("KERNEL_OK")
</pallas_src>

<mosaic_0001>
module attributes {stable_mosaic.version = 11 : i64} {
  func.func @_freq_mask_kernel(%arg0: i32, %arg1: i32, %arg2: memref<4xi32, #tpu.memory_space<smem>>, %arg3: memref<8x128xf32, #tpu.memory_space<vmem>>, %arg4: memref<8x128xf32, #tpu.memory_space<vmem>>) attributes {dimension_semantics = [#tpu.dimension_semantics<parallel>, #tpu.dimension_semantics<arbitrary>], iteration_bounds = array<i64: 1, 2>, scalar_prefetch = 1 : i64, scratch_operands = 0 : i64, tpu.core_type = #tpu.core_type<tc>, window_params = [{transform_indices = @transform_0, window_bounds = array<i64: 8, 128>}, {transform_indices = @transform_1, window_bounds = array<i64: 8, 128>}]} {
    %c0 = arith.constant 0 : index
    %0 = memref.load %arg2[%c0] : memref<4xi32, #tpu.memory_space<smem>>
    %c1 = arith.constant 1 : index
    %1 = memref.load %arg2[%c1] : memref<4xi32, #tpu.memory_space<smem>>
    %c2 = arith.constant 2 : index
    %2 = memref.load %arg2[%c2] : memref<4xi32, #tpu.memory_space<smem>>
    %c3 = arith.constant 3 : index
    %3 = memref.load %arg2[%c3] : memref<4xi32, #tpu.memory_space<smem>>
    %4 = arith.addi %2, %arg1 : i32
    %5 = arith.minsi %4, %3 : i32
    %c128_i32 = arith.constant 128 : i32
    %6 = arith.muli %5, %c128_i32 : i32
    %7 = tpu.iota {dimensions = array<i32: 1>} : vector<1x128xi32>
    %8 = vector.broadcast %6 : i32 to vector<1x128xi32>
    %9 = arith.addi %8, %7 : vector<1x128xi32>
    %10 = vector.broadcast %0 : i32 to vector<1x128xi32>
    %11 = arith.cmpi slt, %9, %10 : vector<1x128xi32>
    %12 = vector.broadcast %1 : i32 to vector<1x128xi32>
    %13 = arith.cmpi sge, %9, %12 : vector<1x128xi32>
    %14 = arith.ori %11, %13 : vector<1x128xi1>
    %c0_0 = arith.constant 0 : index
    %c0_1 = arith.constant 0 : index
    %15 = vector.load %arg3[%c0_0, %c0_1] : memref<8x128xf32, #tpu.memory_space<vmem>>, vector<8x128xf32>
    %cst = arith.constant 0.000000e+00 : f32
    %16 = vector.shape_cast %14 : vector<1x128xi1> to vector<1x128xi1>
    %17 = vector.broadcast %16 : vector<1x128xi1> to vector<8x128xi1>
    %18 = vector.broadcast %cst : f32 to vector<8x128xf32>
    %19 = arith.select %17, %15, %18 : vector<8x128xi1>, vector<8x128xf32>
    %c0_2 = arith.constant 0 : index
    %c0_3 = arith.constant 0 : index
    %20 = vector.load %arg4[%c0_2, %c0_3] : memref<8x128xf32, #tpu.memory_space<vmem>>, vector<8x128xf32>
    tpu.vector_store %arg4[%c0_2, %c0_3], %19 {strides = array<i32>} : memref<8x128xf32, #tpu.memory_space<vmem>>, vector<8x128xf32>,
    return
  }
  func.func @transform_0(%arg0: i32, %arg1: i32, %arg2: memref<4xi32, #tpu.memory_space<smem>>) -> (i32, i32) {
    %c2 = arith.constant 2 : index
    %0 = memref.load %arg2[%c2] : memref<4xi32, #tpu.memory_space<smem>>
    %1 = arith.addi %0, %arg1 : i32
    %c3 = arith.constant 3 : index
    %2 = memref.load %arg2[%c3] : memref<4xi32, #tpu.memory_space<smem>>
    %3 = arith.minsi %1, %2 : i32
    %c0_i32 = arith.constant 0 : i32
    return %arg0, %3 : i32, i32
  }
  func.func @transform_1(%arg0: i32, %arg1: i32, %arg2: memref<4xi32, #tpu.memory_space<smem>>) -> (i32, i32) {
    %c2 = arith.constant 2 : index
    %0 = memref.load %arg2[%c2] : memref<4xi32, #tpu.memory_space<smem>>
    %1 = arith.addi %0, %arg1 : i32
    %c3 = arith.constant 3 : index
    %2 = memref.load %arg2[%c3] : memref<4xi32, #tpu.memory_space<smem>>
    %3 = arith.minsi %1, %2 : i32
    %c0_i32 = arith.constant 0 : i32
    return %arg0, %3 : i32, i32
  }
}

module attributes {stable_mosaic.version = 11 : i64} {
  func.func @_freq_mask_kernel(%arg0: i32, %arg1: i32, %arg2: memref<4xi32, #tpu.memory_space<smem>>, %arg3: memref<8x128xf32, #tpu.memory_space<vmem>>, %arg4: memref<8x128xf32, #tpu.memory_space<vmem>>) attributes {dimension_semantics = [#tpu.dimension_semantics<parallel>, #tpu.dimension_semantics<arbitrary>], iteration_bounds = array<i64: 1, 2>, scalar_prefetch = 1 : i64, scratch_operands = 0 : i64, tpu.core_type = #tpu.core_type<tc>, window_params = [{transform_indices = @transform_0, window_bounds = array<i64: 8, 128>}, {transform_indices = @transform_1, window_bounds = array<i64: 8, 128>}]} {
    %c0 = arith.constant 0 : index
    %0 = memref.load %arg2[%c0] : memref<4xi32, #tpu.memory_space<smem>>
    %c1 = arith.constant 1 : index
    %1 = memref.load %arg2[%c1] : memref<4xi32, #tpu.memory_space<smem>>
    %c2 = arith.constant 2 : index
    %2 = memref.load %arg2[%c2] : memref<4xi32, #tpu.memory_space<smem>>
    %c3 = arith.constant 3 : index
    %3 = memref.load %arg2[%c3] : memref<4xi32, #tpu.memory_space<smem>>
    %4 = arith.addi %2, %arg1 : i32
    %5 = arith.minsi %4, %3 : i32
    %c128_i32 = arith.constant 128 : i32
    %6 = arith.muli %5, %c128_i32 : i32
    %7 = tpu.iota {dimensions = array<i32: 1>} : vector<1x128xi32>
    %8 = vector.broadcast %6 : i32 to vector<1x128xi32>
    %9 = arith.addi %8, %7 : vector<1x128xi32>
    %10 = vector.broadcast %0 : i32 to vector<1x128xi32>
    %11 = arith.cmpi slt, %9, %10 : vector<1x128xi32>
    %12 = vector.broadcast %1 : i32 to vector<1x128xi32>
    %13 = arith.cmpi sge, %9, %12 : vector<1x128xi32>
    %14 = arith.ori %11, %13 : vector<1x128xi1>
    %c0_0 = arith.constant 0 : index
    %c0_1 = arith.constant 0 : index
    %15 = vector.load %arg3[%c0_0, %c0_1] : memref<8x128xf32, #tpu.memory_space<vmem>>, vector<8x128xf32>
    %cst = arith.constant 0.000000e+00 : f32
    %16 = vector.shape_cast %14 : vector<1x128xi1> to vector<1x128xi1>
    %17 = vector.broadcast %16 : vector<1x128xi1> to vector<8x128xi1>
    %18 = vector.broadcast %cst : f32 to vector<8x128xf32>
    %19 = arith.select %17, %15, %18 : vector<8x128xi1>, vector<8x128xf32>
    %c0_2 = arith.constant 0 : index
    %c0_3 = arith.constant 0 : index
    %20 = vector.load %arg4[%c0_2, %c0_3] : memref<8x128xf32, #tpu.memory_space<vmem>>, vector<8x128xf32>
    tpu.vector_store %arg4[%c0_2, %c0_3], %19 {strides = array<i32>} : memref<8x128xf32, #tpu.memory_space<vmem>>, vector<8x128xf32>,
    return
  }
  func.func @transform_0(%arg0: i32, %arg1: i32, %arg2: memref<4xi32, #tpu.memory_space<smem>>) -> (i32, i32) {
    %c2 = arith.constant 2 : index
    %0 = memref.load %arg2[%c2] : memref<4xi32, #tpu.memory_space<smem>>
    %1 = arith.addi %0, %arg1 : i32
    %c3 = arith.constant 3 : index
    %2 = memref.load %arg2[%c3] : memref<4xi32, #tpu.memory_space<smem>>
    %3 = arith.minsi %1, %2 : i32
    %c0_i32 = arith.constant 0 : i32
    return %arg0, %3 : i32, i32
  }
  func.func @transform_1(%arg0: i32, %arg1: i32, %arg2: memref<4xi32, #tpu.memory_space<smem>>) -> (i32, i32) {
    %c2 = arith.constant 2 : index
    %0 = memref.load %arg2[%c2] : memref<4xi32, #tpu.memory_space<smem>>
    %1 = arith.addi %0, %arg1 : i32
    %c3 = arith.constant 3 : index
    %2 = memref.load %arg2[%c3] : memref<4xi32, #tpu.memory_space<smem>>
    %3 = arith.minsi %1, %2 : i32
    %c0_i32 = arith.constant 0 : i32
    return %arg0, %3 : i32, i32
  }
}

</mosaic_0001>

<bundles_post_ra>
// kernel: tpu_custom_call.1
= control target key start
LH: loop header
LB: loop body
LE: loop exit
PB: predicated region body
PF: predicated region fallthrough
CT: control target
= control target key end

     0   :  { %s591_s12 = smov [#allocation3]   ;;  %s772_s0 = inlined_call_operand.vmem [shape: s32[4], index: 0, kind: input, shape index: {}]   ;;  %s773_s1 = inlined_call_operand.hbm [shape: f32[8,256], index: 1, kind: input, shape index: {}, may-alias: {1,2}]   ;;  %s774_s2 = inlined_call_operand.hbm [shape: f32[8,256], index: 2, kind: output, shape index: {}, may-alias: {1,2}]  }
   0x1   :  { %s8_s11 = sshll.u32 %s772_s0, 4  ;;  %s9_s11 = int_to_ptr.vmem [resolvable:$true] %s8_s11 }
   0x2   :  { %11 = dma.vmem_to_smem %s9_s11, 16, %s591_s12, [#allocation2] }
   0x3   :  { %545 = dma.done.wait [#allocation2], 16 }
   0x4   :  { %546 = vsyncadd [#allocation2], 4294967280 }
   0x5   :  { %14 = sfence }
   0x6   :  { %15 = vsyncpa [#allocation5], 0 }
   0x7   :  { %17 = vsyncpa [#allocation5 + $0x1], 0 }
   0x8   :  { %18 = vsyncpa [#allocation6], 0 }
   0x9   :  { %20 = vsyncpa [#allocation6 + $0x1], 0  ;;  %s610_s13 = smov 0   ;;  %s612_s14 = smov 0  }
   0xa   :  { %s614_s15 = smov 0   ;;  %s616_s16 = smov 0  }
   0xb   :  { %s618_s17 = smov 0   ;;  %s620_s0 = smov 0  }
   0xc   :  { %s622_s18 = smov 0   ;;  %s624_s19 = smov 0  }
   0xd   :  { %s626_s20 = smov 0  }
   0xe LB: > { %s323_s21 = sadd.s32 4294967295, %s589_s20   ;;  %s324_s22 = sadd.s32 4294967294, %s589_s20   ;;  %s589_s20 = sphi %s626_s20, %s26_s20   ;;  %s585_s19 = sphi %s624_s19, %s788_s19   ;;  %s581_s18 = sphi %s622_s18, %s787_s18   ;;  %s577_s0 = sphi %s620_s0, %s786_s0   ;;  %s573_s17 = sphi %s618_s17, %s785_s17   ;;  %s569_s16 = sphi %s616_s16, %s784_s16   ;;  %s565_s15 = sphi %s614_s15, %s783_s15   ;;  %s561_s14 = sphi %s612_s14, %s782_s14   ;;  %s557_s13 = sphi %s610_s13, %s781_s13  }
   0xf   : > { %s35_s23 = sadd.s32 1, %s585_s19  ;;  %s325_s24 = sld [smem:[#allocation3 + $0x2]] }
  0x10   : > { %p36_p0 = scmp.ge.s32.totalorder %s35_s23, 2  ;;  %s326_s25 = sld [smem:[#allocation3 + $0x3]] }
  0x11   : > { %s57_s26 = sadd.s32 1, %s577_s0  ;;  %p64_p1 = scmp.ne.s32.totalorder %s577_s0, %s573_s17 }
  0x12   : > { %s790_s23 = smov (%p36_p0, %s35_s23), 0  ;;  %p65_p2 = scmp.eq.s32.totalorder %s589_s20, 0 }
  0x13   : > { %p70_p3 = scmp.ne.s32.totalorder %s573_s17, %s569_s16  ;;  %p71_p4 = scmp.eq.s32.totalorder %s323_s21, 0 }
  0x14   : > { %s95_s27 = sadd.s32 1, %s565_s15  ;;  %p666_p7 = por %p65_p2, %p64_p1 }
  0x15   : > { %s43_s28 = sadd.s32 %s585_s19, %s325_s24  ;;  %s48_s29 = sadd.s32 %s325_s24, %s790_s23 }
  0x16   : > { %p45_p5 = scmp.lt.s32.totalorder %s43_s28, %s326_s25  ;;  %p50_p6 = scmp.lt.s32.totalorder %s48_s29, %s326_s25 }
  0x17   : > { %p670_p8 = por %p71_p4, %p70_p3  ;;  %p105_p9 = scmp.ne.s32.totalorder %s565_s15, %s561_s14 }
  0x18   : > { %s792_s28 = smov (!%p45_p5, %s43_s28), %s326_s25  ;;  %s794_s29 = smov (!%p50_p6, %s48_s29), %s326_s25 }
  0x19   : > { %p106_p10 = scmp.eq.s32.totalorder %s323_s21, 1  ;;  %s53_s4 = ssub.s32 %s792_s28, %s794_s29 }
  0x1a   : > { %p111_p11 = scmp.ne.s32.totalorder %s561_s14, %s557_s13  ;;  %p55_p12 = scmp.eq.s32.totalorder %s53_s4, 0 }
  0x1b   : > { %p678_p13 = por %p106_p10, %p105_p9  ;;  %p112_p0 = scmp.eq.s32.totalorder %s324_s22, 1 }
  0x1c   : > { %s684_s6 = scalar_select %p55_p12, %s577_s0, %s57_s26  }
  0x1d   : > { %s687_s7 = scalar_select %p55_p12, %s565_s15, %s95_s27  }
  0x1e   : > { %p689_p2 = por %p112_p0, %p111_p11  ;;  %p364_p3 = scmp.lt.s32.totalorder %s589_s20, 2 }
  0x1f   : > { %s132_s9 = sand.u32 1, %s577_s0   ;;  %s338_s10 = sshll.u32 %s792_s28, 3 }
  0x20   : > { %s335_s11 = sshll.u32 %s132_s9, 3  ;;  %s147_s21 = scalar_lea.hbm %s773_s1, %s338_s10 }
  0x21   : > { %s149_s22 = sshll.u32 %s147_s21, 4  ;;  %s136_s24 = scalar_lea.vmem [#allocation4], %s335_s11  ;;  %s150_s22 = int_to_ptr.hbm [resolvable:$true] %s149_s22 }
  0x22   : > { %s151_s25 = sshll.u32 %s136_s24, 4  ;;  %p700_p4 = pnand %p364_p3, %p666_p7  ;;  %s152_s25 = int_to_ptr.vmem [resolvable:$true] %s151_s25 }
  0x23   : > { %p339_p5 = scmp.ge.s32.totalorder %s589_s20, 1  ;;  %p156_p6 = scmp.lt.s32.totalorder %s589_s20, 3 }
  0x24   : > { %s133_s27 = scalar_lea.sflag [#allocation5], %s132_s9  ;;  %s451_s28 = sshra.s32 %s150_s22, 4  ;;  %s452_s28 = int_to_ptr.hbm [resolvable:$true] %s451_s28 }
  0x25   : > { %s453_s29 = scalar_lea.hbm %s452_s28, 8  ;;  %p455_p10 = pneg %p700_p4 }
  0x26   : > { %p454_p9 = scmp.ne.s32.totalorder %s452_s28, %s453_s29  ;;  %s458_s30 = scalar_lea.hbm %s773_s1, 16 }
  0x27   : > { %p459_p7 = scmp.lt.s32.totalorder %s452_s28, %s773_s1  ;;  %p460_p0 = scmp.lt.s32.totalorder %s458_s30, %s453_s29 }
  0x28   : > { %p456_p11 = pnand %p455_p10, %p454_p9 }
  0x29   : > { %p461_p3 = por %p460_p0, %p459_p7 }
  0x2a   : > { %p457_p12 = pneg %p456_p11 }
  0x2c   : > { %p462_p1 = pnand %p461_p3, %p457_p12 }
  0x2e   : > { %465 = shalt.err (!%p462_p1)
}
  0x2f   : > { %359 = dma.hbm_to_vmem [thread:$0]  (!%p700_p4), %s150_s22, 128, %s152_s25, %s133_s27  }
  0x30   : > { %p157_p9 = pnand %p339_p5, %p156_p6 }
  0x31   : > { %s162_s9 = sand.u32 (!%p157_p9), 1, %s573_s17  }
  0x32   : > { %160 = sbr.rel (%p157_p9) target bundleno = 81 (0x51), region = 24  ;;  %s340_s16 = sshll.u32 (!%p157_p9), %s162_s9, 3 }
  0x33   : > { %s163_s21 = scalar_lea.sflag (!%p157_p9), [#allocation5], %s162_s9  ;;  %s166_s24 = scalar_lea.vmem (!%p157_p9), [#allocation4], %s340_s16 }
  0x37   : > { %548 = dma.done.wait (%p670_p8), %s163_s21, 128  }
  0x38   : > { %550 = vsyncadd (%p670_p8), %s163_s21, 4294967168  ;;  %s343_s26 = sld [smem:[#allocation3 + $0x2]]  ;;  %s183_s25 = sand.u32 1, %s561_s14   ;;  %v204_v0 = vlaneseq  ;;  %v213_v6 = vld [vmem:[%s166_s24] sm:$0xff] }
  0x39   : > { %s344_s28 = sld [smem:[#allocation3 + $0x3]]  ;;  %s341_s4 = sshll.u32 %s183_s25, 3 }
  0x3a   : > { %s196_s22 = sld [smem:[#allocation3]]  ;;  %v205_v1 = vand.u32 127, %v204_v0  ;;  %s185_s9 = scalar_lea.vmem [#allocation7], %s341_s4 }
  0x3b   : > { %s342_s27 = sld [smem:[#allocation3 + $0x1]]  ;;  %s238_s16 = sshll.u32 %s185_s9, 4  ;;  %s239_s16 = int_to_ptr.vmem [resolvable:$true] %s238_s16 }
  0x3e   : > { %s200_s29 = sadd.s32 %s581_s18, %s343_s26  ;;  %s219_s18 = scalar_lea.sflag [#allocation6], %s183_s25 }
  0x3f   : > { %p201_p1 = scmp.lt.s32.totalorder %s200_s29, %s344_s28 }
  0x40   : > { %v208_v3 = vstv %s196_s22 }
  0x41   : > { %s796_s29 = smov (!%p201_p1, %s200_s29), %s344_s28  ;;  %v210_v4 = vstv %s342_s27 }
  0x42   : > { %s345_s10 = sshll.u32 %s796_s29, 7  ;;  %s349_s30 = sshll.u32 %s796_s29, 3 }
  0x43   : > { %v206_v2 = vstv %s345_s10  ;;  %s236_s12 = scalar_lea.hbm %s774_s2, %s349_s30  ;;  %s501_s29 = scalar_lea.hbm %s774_s2, 16 }
  0x44   : > { %v207_v5 = vadd.s32 %v206_v2, %v205_v1  ;;  %s240_s21 = sshll.u32 %s236_s12, 4  ;;  %s241_s21 = int_to_ptr.hbm [resolvable:$true] %s240_s21 }
  0x45   : > { %s495_s26 = sshra.s32 %s241_s21, 4  ;;  %s496_s26 = int_to_ptr.hbm [resolvable:$true] %s495_s26 }
  0x46   : > { %vm209_vm0 = vcmp.lt.s32.totalorder %v207_v5, %v208_v3  ;;  %vm211_vm1 = vcmp.ge.s32.totalorder %v207_v5, %v210_v4  ;;  %s497_s28 = scalar_lea.hbm %s496_s26, 8  ;;  %p502_p6 = scmp.lt.s32.totalorder %s496_s26, %s774_s2 }
  0x47   : > { %vm212_vm2 = vmor %vm209_vm0, %vm211_vm1  ;;  %p498_p8 = scmp.ne.s32.totalorder %s496_s26, %s497_s28  ;;  %p503_p10 = scmp.lt.s32.totalorder %s501_s29, %s497_s28 }
  0x48   : > { %v216_v7 = vsel %vm212_vm2, %v213_v6, 0.0 }
  0x49   : > { %217 = vst [vmem:[%s185_s9] sm:$0xff] %v216_v7  ;;  %p499_p4 = pnand %p498_p8, %p678_p13  ;;  %p504_p11 = por %p503_p10, %p502_p6 }
  0x4b   : > { %p500_p5 = pneg %p499_p4 }
  0x4d   : > { %p505_p12 = pnand %p504_p11, %p500_p5 }
  0x4f   : > { %508 = shalt.err (!%p505_p12)
}
  0x50   : > { %354 = dma.vmem_to_hbm [thread:$0]  (%p678_p13), %s239_s16, 128, %s241_s21, %s219_s18  }
  0x51 PF: > { %s252_s25 = sand.u32 1, %s557_s13   ;;  %p780_p7 = scmp.ge.s32.totalorder %s589_s20, 2 }
  0x52   : > { %s253_s10 = scalar_lea.sflag [#allocation6], %s252_s25 }
  0x53   : > { %p361_p0 = pnand %p780_p7, %p689_p2 }
  0x55   : > { %p362_p3 = pneg %p361_p0 }
  0x57   : > { %552 = dma.done.wait (%p362_p3), %s253_s10, 128  }
  0x58   : > { %554 = vsyncadd (%p362_p3), %s253_s10, 4294967168  ;;  %s26_s20 = sadd.s32 1, %s589_s20   ;;  %s781_s13 = smov %s561_s14 }
  0x59   : > { %p23_p9 = scmp.ge.s32.totalorder %s26_s20, 4   ;;  %s782_s14 = smov %s565_s15 }
  0x5a   : > { %s783_s15 = smov %s687_s7  ;;  %s784_s16 = smov %s573_s17 }
  0x5b   : > { %s785_s17 = smov %s577_s0  ;;  %s786_s0 = smov %s684_s6 }
  0x5c   : > { %s787_s18 = smov %s585_s19  ;;  %s788_s19 = smov %s790_s23 }
  0x5d   :  { %25 = sbr.rel (!%p23_p9) target bundleno = 14 (0xe), region = 69 }
  0x62   :  { %259 = vsyncpa [#allocation5], 1 }
  0x63   :  { %261 = vsyncpa [#allocation5 + $0x1], 1 }
  0x64   :  { %262 = vsyncpa [#allocation6], 1 }
  0x65   :  { %264 = vsyncpa [#allocation6 + $0x1], 1 }

// kernel: tpu_custom_call.1
= control target key start
LH: loop header
LB: loop body
LE: loop exit
PB: predicated region body
PF: predicated region fallthrough
CT: control target
= control target key end

     0   :  { %s591_s12 = smov [#allocation3]   ;;  %s772_s0 = inlined_call_operand.hbm [shape: s32[4], index: 0, kind: input, shape index: {}]   ;;  %s773_s1 = inlined_call_operand.hbm [shape: f32[8,256], index: 1, kind: input, shape index: {}]   ;;  %s774_s2 = inlined_call_operand.hbm [shape: f32[8,256], index: 2, kind: output, shape index: {}]  }
   0x1   :  { %s8_s11 = sshll.u32 %s772_s0, 4  ;;  %s9_s11 = int_to_ptr.hbm [resolvable:$true] %s8_s11 }
   0x2   :  { %11 = dma.hbm_to_smem %s9_s11, 16, %s591_s12, [#allocation2] }
   0x3   :  { %545 = dma.done.wait [#allocation2], 16 }
   0x4   :  { %546 = vsyncadd [#allocation2], 4294967280 }
   0x5   :  { %14 = sfence }
   0x6   :  { %15 = vsyncpa [#allocation5], 0 }
   0x7   :  { %17 = vsyncpa [#allocation5 + $0x1], 0 }
   0x8   :  { %18 = vsyncpa [#allocation6], 0 }
   0x9   :  { %20 = vsyncpa [#allocation6 + $0x1], 0  ;;  %s610_s13 = smov 0   ;;  %s612_s14 = smov 0  }
   0xa   :  { %s614_s15 = smov 0   ;;  %s616_s16 = smov 0  }
   0xb   :  { %s618_s17 = smov 0   ;;  %s620_s0 = smov 0  }
   0xc   :  { %s622_s18 = smov 0   ;;  %s624_s19 = smov 0  }
   0xd   :  { %s626_s20 = smov 0  }
   0xe LB: > { %s323_s21 = sadd.s32 4294967295, %s589_s20   ;;  %s324_s22 = sadd.s32 4294967294, %s589_s20   ;;  %s589_s20 = sphi %s626_s20, %s26_s20   ;;  %s585_s19 = sphi %s624_s19, %s788_s19   ;;  %s581_s18 = sphi %s622_s18, %s787_s18   ;;  %s577_s0 = sphi %s620_s0, %s786_s0   ;;  %s573_s17 = sphi %s618_s17, %s785_s17   ;;  %s569_s16 = sphi %s616_s16, %s784_s16   ;;  %s565_s15 = sphi %s614_s15, %s783_s15   ;;  %s561_s14 = sphi %s612_s14, %s782_s14   ;;  %s557_s13 = sphi %s610_s13, %s781_s13  }
   0xf   : > { %s35_s23 = sadd.s32 1, %s585_s19  ;;  %s325_s24 = sld [smem:[#allocation3 + $0x2]] }
  0x10   : > { %p36_p0 = scmp.ge.s32.totalorder %s35_s23, 2  ;;  %s326_s25 = sld [smem:[#allocation3 + $0x3]] }
  0x11   : > { %s57_s26 = sadd.s32 1, %s577_s0  ;;  %p64_p1 = scmp.ne.s32.totalorder %s577_s0, %s573_s17 }
  0x12   : > { %s790_s23 = smov (%p36_p0, %s35_s23), 0  ;;  %p65_p2 = scmp.eq.s32.totalorder %s589_s20, 0 }
  0x13   : > { %p70_p3 = scmp.ne.s32.totalorder %s573_s17, %s569_s16  ;;  %p71_p4 = scmp.eq.s32.totalorder %s323_s21, 0 }
  0x14   : > { %s95_s27 = sadd.s32 1, %s565_s15  ;;  %p666_p7 = por %p65_p2, %p64_p1 }
  0x15   : > { %s43_s28 = sadd.s32 %s585_s19, %s325_s24  ;;  %s48_s29 = sadd.s32 %s325_s24, %s790_s23 }
  0x16   : > { %p45_p5 = scmp.lt.s32.totalorder %s43_s28, %s326_s25  ;;  %p50_p6 = scmp.lt.s32.totalorder %s48_s29, %s326_s25 }
  0x17   : > { %p670_p8 = por %p71_p4, %p70_p3  ;;  %p105_p9 = scmp.ne.s32.totalorder %s565_s15, %s561_s14 }
  0x18   : > { %s792_s28 = smov (!%p45_p5, %s43_s28), %s326_s25  ;;  %s794_s29 = smov (!%p50_p6, %s48_s29), %s326_s25 }
  0x19   : > { %p106_p10 = scmp.eq.s32.totalorder %s323_s21, 1  ;;  %s53_s4 = ssub.s32 %s792_s28, %s794_s29 }
  0x1a   : > { %p111_p11 = scmp.ne.s32.totalorder %s561_s14, %s557_s13  ;;  %p55_p12 = scmp.eq.s32.totalorder %s53_s4, 0 }
  0x1b   : > { %p678_p13 = por %p106_p10, %p105_p9  ;;  %p112_p0 = scmp.eq.s32.totalorder %s324_s22, 1 }
  0x1c   : > { %s684_s6 = scalar_select %p55_p12, %s577_s0, %s57_s26  }
  0x1d   : > { %s687_s7 = scalar_select %p55_p12, %s565_s15, %s95_s27  }
  0x1e   : > { %p689_p2 = por %p112_p0, %p111_p11  ;;  %p364_p3 = scmp.lt.s32.totalorder %s589_s20, 2 }
  0x1f   : > { %s132_s9 = sand.u32 1, %s577_s0   ;;  %s338_s10 = sshll.u32 %s792_s28, 3 }
  0x20   : > { %s335_s11 = sshll.u32 %s132_s9, 3  ;;  %s147_s21 = scalar_lea.hbm %s773_s1, %s338_s10 }
  0x21   : > { %s149_s22 = sshll.u32 %s147_s21, 4  ;;  %s136_s24 = scalar_lea.vmem [#allocation4], %s335_s11  ;;  %s150_s22 = int_to_ptr.hbm [resolvable:$true] %s149_s22 }
  0x22   : > { %s151_s25 = sshll.u32 %s136_s24, 4  ;;  %p700_p4 = pnand %p364_p3, %p666_p7  ;;  %s152_s25 = int_to_ptr.vmem [resolvable:$true] %s151_s25 }
  0x23   : > { %p339_p5 = scmp.ge.s32.totalorder %s589_s20, 1  ;;  %p156_p6 = scmp.lt.s32.totalorder %s589_s20, 3 }
  0x24   : > { %s133_s27 = scalar_lea.sflag [#allocation5], %s132_s9  ;;  %s451_s28 = sshra.s32 %s150_s22, 4  ;;  %s452_s28 = int_to_ptr.hbm [resolvable:$true] %s451_s28 }
  0x25   : > { %s453_s29 = scalar_lea.hbm %s452_s28, 8  ;;  %p455_p10 = pneg %p700_p4 }
  0x26   : > { %p454_p9 = scmp.ne.s32.totalorder %s452_s28, %s453_s29  ;;  %s458_s30 = scalar_lea.hbm %s773_s1, 16 }
  0x27   : > { %p459_p7 = scmp.lt.s32.totalorder %s452_s28, %s773_s1  ;;  %p460_p0 = scmp.lt.s32.totalorder %s458_s30, %s453_s29 }
  0x28   : > { %p456_p11 = pnand %p455_p10, %p454_p9 }
  0x29   : > { %p461_p3 = por %p460_p0, %p459_p7 }
  0x2a   : > { %p457_p12 = pneg %p456_p11 }
  0x2c   : > { %p462_p1 = pnand %p461_p3, %p457_p12 }
  0x2e   : > { %465 = shalt.err (!%p462_p1)
}
  0x2f   : > { %359 = dma.hbm_to_vmem [thread:$0]  (!%p700_p4), %s150_s22, 128, %s152_s25, %s133_s27  }
  0x30   : > { %p157_p9 = pnand %p339_p5, %p156_p6 }
  0x31   : > { %s162_s9 = sand.u32 (!%p157_p9), 1, %s573_s17  }
  0x32   : > { %160 = sbr.rel (%p157_p9) target bundleno = 81 (0x51), region = 24  ;;  %s340_s16 = sshll.u32 (!%p157_p9), %s162_s9, 3 }
  0x33   : > { %s163_s21 = scalar_lea.sflag (!%p157_p9), [#allocation5], %s162_s9  ;;  %s166_s24 = scalar_lea.vmem (!%p157_p9), [#allocation4], %s340_s16 }
  0x37   : > { %548 = dma.done.wait (%p670_p8), %s163_s21, 128  }
  0x38   : > { %550 = vsyncadd (%p670_p8), %s163_s21, 4294967168  ;;  %s343_s26 = sld [smem:[#allocation3 + $0x2]]  ;;  %s183_s25 = sand.u32 1, %s561_s14   ;;  %v204_v0 = vlaneseq  ;;  %v213_v6 = vld [vmem:[%s166_s24] sm:$0xff] }
  0x39   : > { %s344_s28 = sld [smem:[#allocation3 + $0x3]]  ;;  %s341_s4 = sshll.u32 %s183_s25, 3 }
  0x3a   : > { %s196_s22 = sld [smem:[#allocation3]]  ;;  %v205_v1 = vand.u32 127, %v204_v0  ;;  %s185_s9 = scalar_lea.vmem [#allocation7], %s341_s4 }
  0x3b   : > { %s342_s27 = sld [smem:[#allocation3 + $0x1]]  ;;  %s238_s16 = sshll.u32 %s185_s9, 4  ;;  %s239_s16 = int_to_ptr.vmem [resolvable:$true] %s238_s16 }
  0x3e   : > { %s200_s29 = sadd.s32 %s581_s18, %s343_s26  ;;  %s219_s18 = scalar_lea.sflag [#allocation6], %s183_s25 }
  0x3f   : > { %p201_p1 = scmp.lt.s32.totalorder %s200_s29, %s344_s28 }
  0x40   : > { %v208_v3 = vstv %s196_s22 }
  0x41   : > { %s796_s29 = smov (!%p201_p1, %s200_s29), %s344_s28  ;;  %v210_v4 = vstv %s342_s27 }
  0x42   : > { %s345_s10 = sshll.u32 %s796_s29, 7  ;;  %s349_s30 = sshll.u32 %s796_s29, 3 }
  0x43   : > { %v206_v2 = vstv %s345_s10  ;;  %s236_s12 = scalar_lea.hbm %s774_s2, %s349_s30  ;;  %s501_s29 = scalar_lea.hbm %s774_s2, 16 }
  0x44   : > { %v207_v5 = vadd.s32 %v206_v2, %v205_v1  ;;  %s240_s21 = sshll.u32 %s236_s12, 4  ;;  %s241_s21 = int_to_ptr.hbm [resolvable:$true] %s240_s21 }
  0x45   : > { %s495_s26 = sshra.s32 %s241_s21, 4  ;;  %s496_s26 = int_to_ptr.hbm [resolvable:$true] %s495_s26 }
  0x46   : > { %vm209_vm0 = vcmp.lt.s32.totalorder %v207_v5, %v208_v3  ;;  %vm211_vm1 = vcmp.ge.s32.totalorder %v207_v5, %v210_v4  ;;  %s497_s28 = scalar_lea.hbm %s496_s26, 8  ;;  %p502_p6 = scmp.lt.s32.totalorder %s496_s26, %s774_s2 }
  0x47   : > { %vm212_vm2 = vmor %vm209_vm0, %vm211_vm1  ;;  %p498_p8 = scmp.ne.s32.totalorder %s496_s26, %s497_s28  ;;  %p503_p10 = scmp.lt.s32.totalorder %s501_s29, %s497_s28 }
  0x48   : > { %v216_v7 = vsel %vm212_vm2, %v213_v6, 0.0 }
  0x49   : > { %217 = vst [vmem:[%s185_s9] sm:$0xff] %v216_v7  ;;  %p499_p4 = pnand %p498_p8, %p678_p13  ;;  %p504_p11 = por %p503_p10, %p502_p6 }
  0x4b   : > { %p500_p5 = pneg %p499_p4 }
  0x4d   : > { %p505_p12 = pnand %p504_p11, %p500_p5 }
  0x4f   : > { %508 = shalt.err (!%p505_p12)
}
  0x50   : > { %354 = dma.vmem_to_hbm [thread:$0]  (%p678_p13), %s239_s16, 128, %s241_s21, %s219_s18  }
  0x51 PF: > { %s252_s25 = sand.u32 1, %s557_s13   ;;  %p780_p7 = scmp.ge.s32.totalorder %s589_s20, 2 }
  0x52   : > { %s253_s10 = scalar_lea.sflag [#allocation6], %s252_s25 }
  0x53   : > { %p361_p0 = pnand %p780_p7, %p689_p2 }
  0x55   : > { %p362_p3 = pneg %p361_p0 }
  0x57   : > { %552 = dma.done.wait (%p362_p3), %s253_s10, 128  }
  0x58   : > { %554 = vsyncadd (%p362_p3), %s253_s10, 4294967168  ;;  %s26_s20 = sadd.s32 1, %s589_s20   ;;  %s781_s13 = smov %s561_s14 }
  0x59   : > { %p23_p9 = scmp.ge.s32.totalorder %s26_s20, 4   ;;  %s782_s14 = smov %s565_s15 }
  0x5a   : > { %s783_s15 = smov %s687_s7  ;;  %s784_s16 = smov %s573_s17 }
  0x5b   : > { %s785_s17 = smov %s577_s0  ;;  %s786_s0 = smov %s684_s6 }
  0x5c   : > { %s787_s18 = smov %s585_s19  ;;  %s788_s19 = smov %s790_s23 }
  0x5d   :  { %25 = sbr.rel (!%p23_p9) target bundleno = 14 (0xe), region = 69 }
  0x62   :  { %259 = vsyncpa [#allocation5], 1 }
  0x63   :  { %261 = vsyncpa [#allocation5 + $0x1], 1 }
  0x64   :  { %262 = vsyncpa [#allocation6], 1 }
  0x65   :  { %264 = vsyncpa [#allocation6 + $0x1], 1 }

</bundles_post_ra>
